<compile_context>
chip_gen: v6e
topology: v6e:2x2x1
jax: 0.10.0
libtpu: 0.0.40
codegen_flags: <defaults>
</compile_context>

<pallas_src>
import functools

import jax
import jax.numpy as jnp
from jax.experimental import pallas as pl
from jax.experimental.pallas import tpu as pltpu


def _policy_mlp_kernel(obs_ref, w1_ref, b1_ref, w2_ref, b2_ref, out_ref, *,
                       mxu_dtype):
    # fc_1 + tanh  (matmul -> MXU, tanh -> EUP)
    x = obs_ref[...].astype(mxu_dtype)
    w1 = w1_ref[...].astype(mxu_dtype)
    h = jnp.tanh(
        jnp.dot(x, w1, preferred_element_type=jnp.float32) + b1_ref[...]
    )
    # fc_2
    w2 = w2_ref[...].astype(mxu_dtype)
    logits = (
        jnp.dot(h.astype(mxu_dtype), w2, preferred_element_type=jnp.float32)
        + b2_ref[...]
    )
    # numerically-stable softmax over the last dim
    m = jnp.max(logits, axis=-1, keepdims=True)
    e = jnp.exp(logits - m)
    denom = jnp.sum(e, axis=-1, keepdims=True)
    # divide on the (otherwise idle) EUP slot; one Newton step keeps the
    # result within ~1e-6 of an exact divide.
    r = pl.reciprocal(denom, approx=True)
    r = r * (2.0 - denom * r)
    out_ref[...] = (e * r).astype(out_ref.dtype)


def pad_hidden(w1, b1, w2, multiple=128):
    """Zero-pad the hidden dim (act_dim*10, e.g. 40) up to a lane-aligned
    multiple. Numerics are unchanged: padded hidden units see zero weight and
    zero bias (tanh(0)=0) and feed zero rows of w2."""
    h1 = w1.shape[1]
    h1_pad = ((h1 + multiple - 1) // multiple) * multiple
    if h1_pad == h1:
        return w1, b1, w2
    pad = h1_pad - h1
    w1p = jnp.pad(w1, ((0, 0), (0, pad)))
    b1p = jnp.pad(b1, ((0, 0), (0, pad)))
    w2p = jnp.pad(w2, ((0, pad), (0, 0)))
    return w1p, b1p, w2p


def policy_forward(obs, w1, b1, w2, b2, *, batch_tile=256,
                   mxu_dtype=jnp.float32):
    """obs: [B, obs_dim] f32; w1: [obs_dim, h1]; b1: [1, h1];
    w2: [h1, act_dim]; b2: [1, act_dim]  ->  probs: [B, act_dim] f32.

    mxu_dtype=jnp.bfloat16 halves MXU passes / weight bytes on v6e/v7x for
    large batches (keep f32 when bit-accurate checks matter)."""
    B, obs_dim = obs.shape
    h1 = w1.shape[1]
    act_dim = w2.shape[1]
    kernel = functools.partial(_policy_mlp_kernel, mxu_dtype=mxu_dtype)

    if B <= batch_tile:
        # Small batch: single-shot kernel, no grid, no pipeline machinery.
        return pl.pallas_call(
            kernel,
            out_shape=jax.ShapeDtypeStruct((B, act_dim), jnp.float32),
        )(obs, w1, b1, w2, b2)

    # Large batch: stream batch tiles through a pipelined grid. Weights and
    # biases use a constant index_map (VMEM-resident across steps); obs/out
    # tiles are double-buffered by the BlockSpec pipeline. "parallel" lets
    # megacore chips (v7x) shard the batch axis across TensorCores.
    n_tiles = pl.cdiv(B, batch_tile)
    B_pad = n_tiles * batch_tile
    obs_in = obs if B_pad == B else jnp.pad(obs, ((0, B_pad - B), (0, 0)))
    out = pl.pallas_call(
        kernel,
        out_shape=jax.ShapeDtypeStruct((B_pad, act_dim), jnp.float32),
        grid=(n_tiles,),
        in_specs=[
            pl.BlockSpec((batch_tile, obs_dim), lambda i: (i, 0)),
            pl.BlockSpec((obs_dim, h1), lambda i: (0, 0)),
            pl.BlockSpec((1, h1), lambda i: (0, 0)),
            pl.BlockSpec((h1, act_dim), lambda i: (0, 0)),
            pl.BlockSpec((1, act_dim), lambda i: (0, 0)),
        ],
        out_specs=pl.BlockSpec((batch_tile, act_dim), lambda i: (i, 0)),
        compiler_params=pltpu.CompilerParams(
            dimension_semantics=("parallel",)
        ),
    )(obs_in, w1, b1, w2, b2)
    return out[:B] if B_pad != B else out


def init_params(key, obs_dim, act_dim):
    """Deterministic synthetic init mirroring nn.Linear shapes.
    PyTorch stores W as (out, in); we store the transpose (in, out)."""
    h1_dim = act_dim * 10
    k1, k2, k3, k4 = jax.random.split(key, 4)
    # Uniform(-1/sqrt(fan_in), 1/sqrt(fan_in)), like PyTorch's default.
    lim1 = 1.0 / (obs_dim ** 0.5)
    lim2 = 1.0 / (h1_dim ** 0.5)
    w1 = jax.random.uniform(k1, (obs_dim, h1_dim), jnp.float32, -lim1, lim1)
    b1 = jax.random.uniform(k2, (1, h1_dim), jnp.float32, -lim1, lim1)
    w2 = jax.random.uniform(k3, (h1_dim, act_dim), jnp.float32, -lim2, lim2)
    b2 = jax.random.uniform(k4, (1, act_dim), jnp.float32, -lim2, lim2)
    return w1, b1, w2, b2


if __name__ == "__main__":
    obs_dim = 32
    act_dim = 4  # h1_dim = 40, padded to 128 inside pad_hidden

    key = jax.random.PRNGKey(0)
    k_obs_s, k_obs_l, k_params = jax.random.split(key, 3)

    w1, b1, w2, b2 = init_params(k_params, obs_dim, act_dim)
    w1p, b1p, w2p = pad_hidden(w1, b1, w2)  # hidden dim 40 -> 128 (zeros)

    def ref_forward(o):  # plain-JAX reference (same math, unpadded weights)
        return jax.nn.softmax(jnp.tanh(o @ w1 + b1) @ w2 + b2, axis=-1)

    # --- small-batch path: no grid, single shot ---
    obs_s = jax.random.normal(k_obs_s, (8, obs_dim), dtype=jnp.float32)
    probs_s = jax.block_until_ready(policy_forward(obs_s, w1p, b1p, w2p, b2))
    assert probs_s.shape == (8, act_dim)
    assert jnp.allclose(probs_s, ref_forward(obs_s), atol=1e-5, rtol=1e-5)
    assert jnp.allclose(jnp.sum(probs_s, axis=-1), 1.0, atol=1e-5)

    # --- large-batch path: batch-tiled, pipelined, "parallel" grid axis ---
    obs_l = jax.random.normal(k_obs_l, (512, obs_dim), dtype=jnp.float32)
    probs_l = jax.block_until_ready(
        policy_forward(obs_l, w1p, b1p, w2p, b2, batch_tile=256)
    )
    assert probs_l.shape == (512, act_dim)
    assert jnp.allclose(probs_l, ref_forward(obs_l), atol=1e-5, rtol=1e-5)
    assert jnp.allclose(jnp.sum(probs_l, axis=-1), 1.0, atol=1e-5)

    print("KERNEL_OK")
</pallas_src>

<mosaic_0001>
module attributes {stable_mosaic.version = 11 : i64} {
  func.func @_policy_mlp_kernel(%arg0: memref<8x32xf32, #tpu.memory_space<vmem>>, %arg1: memref<32x128xf32, #tpu.memory_space<vmem>>, %arg2: memref<1x128xf32, #tpu.memory_space<vmem>>, %arg3: memref<128x4xf32, #tpu.memory_space<vmem>>, %arg4: memref<1x4xf32, #tpu.memory_space<vmem>>, %arg5: memref<8x4xf32, #tpu.memory_space<vmem>>) attributes {dimension_semantics = [], scalar_prefetch = 0 : i64, scratch_operands = 0 : i64, tpu.core_type = #tpu.core_type<tc>} {
    %c0 = arith.constant 0 : index
    %c0_0 = arith.constant 0 : index
    %0 = vector.load %arg0[%c0, %c0_0] : memref<8x32xf32, #tpu.memory_space<vmem>>, vector<8x32xf32>
    %c0_1 = arith.constant 0 : index
    %c0_2 = arith.constant 0 : index
    %1 = vector.load %arg1[%c0_1, %c0_2] : memref<32x128xf32, #tpu.memory_space<vmem>>, vector<32x128xf32>
    %cst = arith.constant dense<0.000000e+00> : vector<8x128xf32>
    %2 = tpu.matmul %0, %1, %cst {dimension_numbers = #tpu.dot_dimension_numbers<[1], [0], [0], [1], [0, 0, 1, 1], [], []>} : vector<8x32xf32>, vector<32x128xf32>, vector<8x128xf32> -> vector<8x128xf32>
    %c0_3 = arith.constant 0 : index
    %c0_4 = arith.constant 0 : index
    %3 = vector.load %arg2[%c0_3, %c0_4] : memref<1x128xf32, #tpu.memory_space<vmem>>, vector<1x128xf32>
    %4 = vector.broadcast %3 : vector<1x128xf32> to vector<8x128xf32>
    %5 = arith.addf %2, %4 : vector<8x128xf32>
    %6 = math.tanh %5 : vector<8x128xf32>
    %c0_5 = arith.constant 0 : index
    %c0_6 = arith.constant 0 : index
    %7 = vector.load %arg3[%c0_5, %c0_6] : memref<128x4xf32, #tpu.memory_space<vmem>>, vector<128x4xf32>
    %cst_7 = arith.constant dense<0.000000e+00> : vector<8x4xf32>
    %8 = tpu.matmul %6, %7, %cst_7 {dimension_numbers = #tpu.dot_dimension_numbers<[1], [0], [0], [1], [0, 0, 1, 1], [], []>} : vector<8x128xf32>, vector<128x4xf32>, vector<8x4xf32> -> vector<8x4xf32>
    %c0_8 = arith.constant 0 : index
    %c0_9 = arith.constant 0 : index
    %9 = vector.load %arg4[%c0_8, %c0_9] : memref<1x4xf32, #tpu.memory_space<vmem>>, vector<1x4xf32>
    %10 = vector.broadcast %9 : vector<1x4xf32> to vector<8x4xf32>
    %11 = arith.addf %8, %10 : vector<8x4xf32>
    %cst_10 = arith.constant dense<0xFF800000> : vector<8xf32>
    %12 = vector.multi_reduction <maximumf>, %11, %cst_10 [1] : vector<8x4xf32> to vector<8xf32>
    %13 = vector.shape_cast %12 : vector<8xf32> to vector<8x1xf32>
    %14 = vector.broadcast %13 : vector<8x1xf32> to vector<8x4xf32>
    %15 = arith.subf %11, %14 : vector<8x4xf32>
    %16 = math.exp %15 : vector<8x4xf32>
    %cst_11 = arith.constant dense<0.000000e+00> : vector<8xf32>
    %17 = vector.multi_reduction <add>, %16, %cst_11 [1] : vector<8x4xf32> to vector<8xf32>
    %18 = vector.shape_cast %17 : vector<8xf32> to vector<8x1xf32>
    %19 = tpu.reciprocal %18 {approx = true} : vector<8x1xf32> -> vector<8x1xf32>
    %20 = arith.mulf %18, %19 : vector<8x1xf32>
    %cst_12 = arith.constant 2.000000e+00 : f32
    %21 = vector.broadcast %cst_12 : f32 to vector<8x1xf32>
    %22 = arith.subf %21, %20 : vector<8x1xf32>
    %23 = arith.mulf %19, %22 : vector<8x1xf32>
    %24 = vector.broadcast %23 : vector<8x1xf32> to vector<8x4xf32>
    %25 = arith.mulf %16, %24 : vector<8x4xf32>
    %c0_13 = arith.constant 0 : index
    %c0_14 = arith.constant 0 : index
    %26 = vector.load %arg5[%c0_13, %c0_14] : memref<8x4xf32, #tpu.memory_space<vmem>>, vector<8x4xf32>
    tpu.vector_store %arg5[%c0_13, %c0_14], %25 {strides = array<i32>} : memref<8x4xf32, #tpu.memory_space<vmem>>, vector<8x4xf32>,
    return
  }
}

</mosaic_0001>

<bundles_post_ra>
// kernel: tpu_custom_call.1
= control target key start
LH: loop header
LB: loop body
LE: loop exit
PB: predicated region body
PF: predicated region fallthrough
CT: control target
= control target key end

     0   :  { %v299_v0 = vmov 0.0   ;;  %vm300_vm0 = vmmov 0   ;;  %vm32_vm1 = vcmask 261120   ;;  %vm200_vm2 = vcmask 31744   ;;  %s430_s1 = inlined_call_operand.vmem [shape: f32[32,128], index: 1, kind: input, shape index: {}]   ;;  %s431_s3 = inlined_call_operand.vmem [shape: f32[128,4], index: 3, kind: input, shape index: {}]   ;;  %s432_s0 = inlined_call_operand.vmem [shape: f32[8,32], index: 0, kind: input, shape index: {}]   ;;  %s433_s2 = inlined_call_operand.vmem [shape: f32[1,128], index: 2, kind: input, shape index: {}]   ;;  %s434_s4 = inlined_call_operand.vmem [shape: f32[1,4], index: 4, kind: input, shape index: {}]   ;;  %s435_s5 = inlined_call_operand.vmem [shape: f32[8,4], index: 5, kind: output, shape index: {}]  }
   0x1   :  { %245 = vmatprep.subr.mxu0 %v299_v0  ;;  %v24_v1 = vld [vmem:[%s430_s1 + $0x18] sm:$0xff]  ;;  %v23_v2 = vld [vmem:[%s430_s1 + $0x10] sm:$0xff]  ;;  %253 = vmatprep.mubr.msk.f32.mxu0 %vm300_vm0, %v299_v0  ;;  %v22_v4 = vld [vmem:[%s430_s1 + $0x8] sm:$0xff] }
   0x2   :  { %246 = vmatpush3.msra.mxu0 %v24_v1  ;;  %256 = vmatprep.subr.mxu1 %v299_v0  ;;  %v122_v3 = vld [vmem:[%s431_s3 + $0x78] sm:$0xff]  ;;  %v121_v5 = vld [vmem:[%s431_s3 + $0x70] sm:$0xff]  ;;  %v120_v6 = vld [vmem:[%s431_s3 + $0x68] sm:$0xff] }
   0x3   :  { %247 = vmatprep.subr.mxu0 %v299_v0  ;;  %257 = vmatpush3.msra.mxu1 %v122_v3  ;;  %v21_v7 = vld [vmem:[%s430_s1] sm:$0xff]  ;;  %v118_v10 = vld [vmem:[%s431_s3 + $0x58] sm:$0xff]  ;;  %v117_v11 = vld [vmem:[%s431_s3 + $0x50] sm:$0xff] }
   0x4   :  { %248 = vmatpush3.msra.mxu0 %v23_v2  ;;  %258 = vmatprep.subr.mxu1 %v299_v0  ;;  %v20_v8 = vld [vmem:[%s432_s0] sm:$0xff]  ;;  %v116_v12 = vld [vmem:[%s431_s3 + $0x48] sm:$0xff]  ;;  %v114_v14 = vld [vmem:[%s431_s3 + $0x38] sm:$0xff] }
   0x5   :  { %249 = vmatprep.subr.mxu0 %v299_v0  ;;  %259 = vmatpush3.msra.mxu1 %v121_v5  ;;  %v119_v9 = vld [vmem:[%s431_s3 + $0x60] sm:$0xff]  ;;  %v113_v15 = vld [vmem:[%s431_s3 + $0x30] sm:$0xff]  ;;  %v112_v16 = vld [vmem:[%s431_s3 + $0x28] sm:$0xff] }
   0x6   :  { %250 = vmatpush3.msra.mxu0 %v22_v4  ;;  %260 = vmatprep.subr.mxu1 %v299_v0  ;;  %v115_v13 = vld [vmem:[%s431_s3 + $0x40] sm:$0xff]  ;;  %v110_v18 = vld [vmem:[%s431_s3 + $0x18] sm:$0xff]  ;;  %v109_v19 = vld [vmem:[%s431_s3 + $0x10] sm:$0xff] }
   0x7   :  { %251 = vmatprep.subr.mxu0 %v299_v0  ;;  %261 = vmatpush3.msra.mxu1 %v120_v6  ;;  %v111_v17 = vld [vmem:[%s431_s3 + $0x20] sm:$0xff]  ;;  %v108_v20 = vld [vmem:[%s431_s3 + $0x8] sm:$0xff] }
   0x8   :  { %252 = vmatpush3.msra.mxu0 %v21_v7  ;;  %262 = vmatprep.subr.mxu1 %v299_v0  ;;  %v107_v21 = vld [vmem:[%s431_s3] sm:$0xff] }
   0x9   :  { %254 = vmatmul.mubr.msk.f32.vlgmr.msra.gmra.mxu0 %vm32_vm1, %v20_v8  ;;  %263 = vmatpush3.msra.mxu1 %v119_v9  ;;  %v220_v22 = vld [vmem:[%s433_s2] ss:$0 sm:$0xff] }
   0xa   :  { %264 = vmatprep.subr.mxu1 %v299_v0  ;;  %288 = vmatprep.mubr.msk.f32.mxu1 %vm300_vm0, %v299_v0  ;;  %v222_v27 = vld [vmem:[%s434_s4] ss:$0 sm:$0xff] }
   0xb   :  { %265 = vmatpush3.msra.mxu1 %v118_v10 }
   0xc   :  { %266 = vmatprep.subr.mxu1 %v299_v0 }
   0xd   :  { %267 = vmatpush3.msra.mxu1 %v117_v11 }
   0xe   :  { %268 = vmatprep.subr.mxu1 %v299_v0 }
   0xf   :  { %269 = vmatpush3.msra.mxu1 %v116_v12 }
  0x10   :  { %270 = vmatprep.subr.mxu1 %v299_v0 }
  0x11   :  { %271 = vmatpush3.msra.mxu1 %v115_v13 }
  0x12   :  { %272 = vmatprep.subr.mxu1 %v299_v0 }
  0x13   :  { %273 = vmatpush3.msra.mxu1 %v114_v14 }
  0x14   :  { %274 = vmatprep.subr.mxu1 %v299_v0 }
  0x15   :  { %275 = vmatpush3.msra.mxu1 %v113_v15 }
  0x16   :  { %276 = vmatprep.subr.mxu1 %v299_v0 }
  0x17   :  { %277 = vmatpush3.msra.mxu1 %v112_v16 }
  0x18   :  { %278 = vmatprep.subr.mxu1 %v299_v0 }
  0x19   :  { %279 = vmatpush3.msra.mxu1 %v111_v17 }
  0x1a   :  { %280 = vmatprep.subr.mxu1 %v299_v0 }
  0x1b   :  { %281 = vmatpush3.msra.mxu1 %v110_v18 }
  0x1c   :  { %282 = vmatprep.subr.mxu1 %v299_v0 }
  0x1d   :  { %283 = vmatpush3.msra.mxu1 %v109_v19 }
  0x1e   :  { %284 = vmatprep.subr.mxu1 %v299_v0 }
  0x1f   :  { %285 = vmatpush3.msra.mxu1 %v108_v20 }
  0x20   :  { %286 = vmatprep.subr.mxu1 %v299_v0 }
  0x21   :  { %287 = vmatpush3.msra.mxu1 %v107_v21 }
  0xc9   :  { %v102_v23 = vpop.f32.mrf.mxu0 }
  0xca   :  { %v103_v24 = vadd.f32 %v220_v22, %v102_v23 }
  0xcb   :  { %v255_v25 = vpop.f32.mrf.mxu0 }
  0xcc   :  { %293 = vtanh.f32 %v103_v24 }
  0xd9   :  { %v294_v26 = vpop.eup %293 }
  0xda   :  { %289 = vmatmul.mubr.f32.vlgmr.msra.gmra.mxu1 %v294_v26 }
 0x19a   :  { %v196_v28 = vpop.f32.mrf.mxu1 }
 0x19b   :  { %v197_v29 = vadd.f32 %v222_v27, %v196_v28 }
 0x19c   :  { %v290_v30 = vpop.f32.mrf.mxu1 }
 0x19d   :  { %v201_v31 = vsel %vm200_vm2, %v197_v29, -inf }
 0x19e   :  { %202 = vmax.xlane.f32.xlu0 %v201_v31 }
 0x227   :  { %v203_v32 = vpop.xlane.xlu0 %202 }
 0x228   :  { %v204_v33 = vsub.f32 %v197_v29, %v203_v32 }
 0x22a   :  { %v205_v34 = vmul.f32 1.442695, %v204_v33 }
 0x22c   :  { %295 = vpow2.f32 %v205_v34 }
 0x239   :  { %v296_v35 = vpop.eup %295 }
 0x23a   :  { %v207_v36 = vsel %vm200_vm2, %v296_v35, 0.0 }
 0x23b   :  { %208 = vadd.xlane.f32.xlu0 %v207_v36 }
 0x2c4   :  { %v209_v37 = vpop.xlane.xlu0 %208 }
 0x2c5   :  { %297 = vrcp.f32 %v209_v37 }
 0x2d2   :  { %v298_v38 = vpop.eup %297 }
 0x2d3   :  { %v211_v39 = vmul.f32 %v298_v38, %v209_v37 }
 0x2d5   :  { %v212_v40 = vsub.f32 2.0, %v211_v39 }
 0x2d7   :  { %v213_v41 = vmul.f32 %v298_v38, %v212_v40 }
 0x2d9   :  { %v214_v42 = vmul.f32 %v296_v35, %v213_v41 }
 0x2db   :  { %215 = vst.msk [vmem:[%s435_s5] sm:$0xff] %vm200_vm2, %v214_v42 }

</bundles_post_ra>
